<compile_context>
chip_gen: v5e
topology: v5e:2x2
jax: 0.10.0
libtpu: 0.0.40
codegen_flags: <defaults>
</compile_context>

<pallas_src>
import math

import jax
import jax.numpy as jnp
from jax.experimental import pallas as pl
from jax.experimental.pallas import tpu as pltpu


def _round_up(a: int, b: int) -> int:
    return ((a + b - 1) // b) * b


# ---------------------------------------------------------------------------
# Fused kernel (reassociated):
#   acc[i]  = sum_k adj[i,k] @ x[k]                      (f32 accumulate)
#   out[i]  = round(acc[i] @ W, 3 decimals) + bias       (k == last epilogue)
# grid = (row tiles i, reduction tiles k)
# ---------------------------------------------------------------------------
def _make_gcn_kernel(tile_k: int, x_resident: bool):
    def kernel(adj_ref, x_ref, w_ref, b_ref, o_ref, acc_ref):
        k = pl.program_id(1)

        @pl.when(k == 0)
        def _():
            acc_ref[...] = jnp.zeros_like(acc_ref)

        if x_resident:
            # x is fully VMEM-resident; slice the K window in-kernel.
            start = pl.multiple_of(k * tile_k, 128)
            x_k = x_ref[pl.ds(start, tile_k), :]
        else:
            x_k = x_ref[...]

        # Aggregation on the MXU: (tile_m, tile_k) @ (tile_k, f_in_pad).
        acc_ref[...] += jnp.dot(adj_ref[...], x_k,
                                preferred_element_type=jnp.float32)

        @pl.when(k == pl.num_programs(1) - 1)
        def _():
            # Once per row tile: project through W, then round to 3 decimals
            # (np.around == round-half-to-even(x*1000)/1000, keep true
            # division), then add bias (single fused broadcast + store).
            y = jnp.dot(acc_ref[...], w_ref[...],
                        preferred_element_type=jnp.float32)
            r = jnp.round(y * 1000.0) / 1000.0
            o_ref[...] = (r + b_ref[...]).astype(o_ref.dtype)

    return kernel


def graph_convolution(x, weight, bias, adj, *,
                      tile_m=512, tile_k=2048,
                      input_dtype=jnp.bfloat16,
                      x_resident=None):
    """Pallas implementation of GraphConvolution.forward (compute_gcn path).

    input_dtype: dtype used to stream adj / x from HBM into the MXU
      (bfloat16 by default; accumulation and epilogue stay float32).
    x_resident: force x VMEM-resident (True) / streamed per K tile (False);
      None = automatic based on size.
    """
    n, f_in = x.shape
    f_out = weight.shape[1]
    assert adj.shape == (n, n)

    # ---- lane-dense padding: f_in and f_out up to multiples of 128 ----------
    f_in_pad = _round_up(max(f_in, 128), 128)
    f_out_pad = _round_up(max(f_out, 128), 128)

    w_p = jnp.pad(weight.astype(jnp.float32),
                  ((0, f_in_pad - f_in), (0, f_out_pad - f_out)))
    if bias is None:
        b_p = jnp.zeros((1, f_out_pad), jnp.float32)
    else:
        b_p = jnp.pad(bias.astype(jnp.float32),
                      (0, f_out_pad - f_out)).reshape(1, f_out_pad)

    # ---- tile sizes ----------------------------------------------------------
    tile_k = int(min(tile_k, _round_up(n, 128)))      # lane dim of adj: mult of 128
    tile_m = int(min(tile_m, _round_up(n, 8)))        # sublane dim: mult of 8
    if n > 8:
        # Guarantee >= 2 row tiles so the "parallel" axis shards across the two
        # TensorCores on v7x (no-op on single-TC v5e/v6e).
        tile_m = int(min(tile_m, _round_up((n + 1) // 2, 8)))

    # ---- cdiv-style zero padding so the grid divides evenly ------------------
    # Zero rows/cols of adj, zero rows of x and zero-padded feature columns
    # contribute nothing; padded output rows/columns are sliced off below.
    n_pad_m = _round_up(n, tile_m)
    n_pad_k = _round_up(n, tile_k)
    adj_p = jnp.pad(adj.astype(input_dtype),
                    ((0, n_pad_m - n), (0, n_pad_k - n)))
    x_p = jnp.pad(x.astype(input_dtype),
                  ((0, n_pad_k - n), (0, f_in_pad - f_in)))

    isz = jnp.dtype(input_dtype).itemsize

    # x resident in VMEM (fetched once) if it fits a small budget; otherwise
    # stream a (tile_k, f_in_pad) slice per K step.
    if x_resident is None:
        x_resident = n_pad_k * f_in_pad * isz <= 4 * 1024 * 1024
    if x_resident:
        x_spec = pl.BlockSpec((n_pad_k, f_in_pad), lambda i, k: (0, 0))
        x_buf_rows = n_pad_k
    else:
        x_spec = pl.BlockSpec((tile_k, f_in_pad), lambda i, k: (k, 0))
        x_buf_rows = tile_k

    grid = (n_pad_m // tile_m, n_pad_k // tile_k)

    # ---- VMEM budget: double-buffered working set, capped at 48 MiB ---------
    # (safe on v7x's 64 MiB per-TC VMEM; well below v5e/v6e's 128 MiB).
    est_vmem = (2 * tile_m * tile_k * isz            # adj tiles (double-buffered)
                + 2 * x_buf_rows * f_in_pad * isz    # x buffer(s)
                + 2 * f_in_pad * f_out_pad * 4       # weight
                + 2 * 8 * f_out_pad * 4              # bias (sublane-padded)
                + 2 * tile_m * f_out_pad * 4         # output tiles
                + tile_m * f_in_pad * 4)             # f32 accumulator scratch
    vmem_limit = int(min(48 * 1024 * 1024,
                         max(32 * 1024 * 1024, 2 * est_vmem)))

    out = pl.pallas_call(
        _make_gcn_kernel(tile_k, x_resident),
        out_shape=jax.ShapeDtypeStruct((n_pad_m, f_out_pad), jnp.float32),
        grid_spec=pltpu.PrefetchScalarGridSpec(
            num_scalar_prefetch=0,
            grid=grid,
            in_specs=[
                pl.BlockSpec((tile_m, tile_k), lambda i, k: (i, k)),    # adj tile
                x_spec,                                                 # x (resident or K-slice)
                pl.BlockSpec((f_in_pad, f_out_pad), lambda i, k: (0, 0)),  # full W (small, constant)
                pl.BlockSpec((1, f_out_pad), lambda i, k: (0, 0)),         # bias (tiny, constant)
            ],
            out_specs=pl.BlockSpec((tile_m, f_out_pad), lambda i, k: (i, 0)),
            scratch_shapes=[pltpu.VMEM((tile_m, f_in_pad), jnp.float32)],
        ),
        compiler_params=pltpu.CompilerParams(
            dimension_semantics=("parallel", "arbitrary"),
            vmem_limit_bytes=vmem_limit,
        ),
    )(adj_p, x_p, w_p, b_p)

    return out[:n, :f_out]


if __name__ == "__main__":
    # Small deterministic problem: N nodes, in_features, out_features.
    N, F_IN, F_OUT = 256, 64, 32

    key = jax.random.PRNGKey(0)
    k_x, k_w, k_b, k_a = jax.random.split(key, 4)

    # Deterministic parameter init mirroring reset_parameters():
    # uniform(-stdv, stdv) with stdv = 1/sqrt(out_features)
    stdv = 1.0 / math.sqrt(F_OUT)
    weight = jax.random.uniform(k_w, (F_IN, F_OUT), jnp.float32,
                                minval=-stdv, maxval=stdv)
    bias = jax.random.uniform(k_b, (F_OUT,), jnp.float32,
                              minval=-stdv, maxval=stdv)

    # Node feature matrix.
    x = jax.random.normal(k_x, (N, F_IN), jnp.float32)

    # Row-normalized dense adjacency (with self loops), as a GCN would use.
    a = (jax.random.uniform(k_a, (N, N)) < 0.1).astype(jnp.float32)
    a = a + jnp.eye(N, dtype=jnp.float32)
    adj = a / jnp.sum(a, axis=1, keepdims=True)

    # Default path: bf16 adj/x stream, reassociated (A@X)@W, resident x,
    # >= 2 row tiles.
    out = graph_convolution(x, weight, bias, adj)
    jax.block_until_ready(out)

    # Plain-JAX f32 reference of the PyTorch forward.  Tolerance covers bf16
    # input quantization + MXU default-precision truncation (both sides) plus
    # possible +-1e-3 flips of the round-to-3-decimals boundary; structural
    # bugs (wrong tiling / association / missing bias) give errors >= 3e-2.
    ref = jnp.round((adj @ (x @ weight)) * 1000.0) / 1000.0 + bias
    assert out.shape == (N, F_OUT)
    assert jnp.allclose(out, ref, atol=1e-2, rtol=0.0)

    # Second run: non-divisible graph size, forced multi-step K accumulation,
    # streamed (non-resident) x path, float32 inputs.
    N2 = 300
    k_x2, k_a2 = jax.random.split(jax.random.PRNGKey(1), 2)
    x2 = jax.random.normal(k_x2, (N2, F_IN), jnp.float32)
    a2 = (jax.random.uniform(k_a2, (N2, N2)) < 0.1).astype(jnp.float32)
    a2 = a2 + jnp.eye(N2, dtype=jnp.float32)
    adj2 = a2 / jnp.sum(a2, axis=1, keepdims=True)

    out2 = graph_convolution(x2, weight, bias, adj2,
                             tile_m=64, tile_k=128,
                             input_dtype=jnp.float32, x_resident=False)
    jax.block_until_ready(out2)
    ref2 = jnp.round((adj2 @ (x2 @ weight)) * 1000.0) / 1000.0 + bias
    assert out2.shape == (N2, F_OUT)
    assert jnp.allclose(out2, ref2, atol=1e-2, rtol=0.0)

    print("KERNEL_OK")
</pallas_src>

<mosaic_0001>
module attributes {stable_mosaic.version = 11 : i64} {
  func.func @kernel(%arg0: i32, %arg1: i32, %arg2: memref<128x256xbf16, #tpu.memory_space<vmem>>, %arg3: memref<256x128xbf16, #tpu.memory_space<vmem>>, %arg4: memref<128x128xf32, #tpu.memory_space<vmem>>, %arg5: memref<1x128xf32, #tpu.memory_space<vmem>>, %arg6: memref<128x128xf32, #tpu.memory_space<vmem>>, %arg7: memref<128x128xf32, #tpu.memory_space<vmem>>) attributes {dimension_semantics = [#tpu.dimension_semantics<parallel>, #tpu.dimension_semantics<arbitrary>], iteration_bounds = array<i64: 2, 1>, scalar_prefetch = 0 : i64, scratch_operands = 1 : i64, tpu.core_type = #tpu.core_type<tc>, window_params = [{transform_indices = @transform_0, window_bounds = array<i64: 128, 256>}, {pipeline_mode = #tpu.pipeline_mode<synchronous>, transform_indices = @transform_1, window_bounds = array<i64: 256, 128>}, {pipeline_mode = #tpu.pipeline_mode<synchronous>, transform_indices = @transform_2, window_bounds = array<i64: 128, 128>}, {pipeline_mode = #tpu.pipeline_mode<synchronous>, transform_indices = @transform_3, window_bounds = array<i64: 1, 128>}, {transform_indices = @transform_4, window_bounds = array<i64: 128, 128>}]} {
    %c0_i32 = arith.constant 0 : i32
    %0 = arith.cmpi eq, %arg1, %c0_i32 : i32
    %1 = arith.extui %0 : i1 to i32
    %c0_i32_0 = arith.constant 0 : i32
    %2 = arith.cmpi ne, %1, %c0_i32_0 : i32
    scf.if %2 {
      %cst_9 = arith.constant 0.000000e+00 : f32
      %15 = vector.broadcast %cst_9 : f32 to vector<128x128xf32>
      %c0_10 = arith.constant 0 : index
      %c0_11 = arith.constant 0 : index
      %16 = vector.load %arg7[%c0_10, %c0_11] : memref<128x128xf32, #tpu.memory_space<vmem>>, vector<128x128xf32>
      tpu.vector_store %arg7[%c0_10, %c0_11], %15 {strides = array<i32>} : memref<128x128xf32, #tpu.memory_space<vmem>>, vector<128x128xf32>,
    } else {
    }
    %c256_i32 = arith.constant 256 : i32
    %3 = arith.muli %arg1, %c256_i32 : i32
    %4 = tpu.assume_multiple %3, 128 : i32
    %5 = arith.index_cast %4 : i32 to index
    %c0 = arith.constant 0 : index
    %6 = vector.load %arg3[%5, %c0] : memref<256x128xbf16, #tpu.memory_space<vmem>>, vector<256x128xbf16>
    %c0_1 = arith.constant 0 : index
    %c0_2 = arith.constant 0 : index
    %7 = vector.load %arg7[%c0_1, %c0_2] : memref<128x128xf32, #tpu.memory_space<vmem>>, vector<128x128xf32>
    %c0_3 = arith.constant 0 : index
    %c0_4 = arith.constant 0 : index
    %8 = vector.load %arg2[%c0_3, %c0_4] : memref<128x256xbf16, #tpu.memory_space<vmem>>, vector<128x256xbf16>
    %cst = arith.constant dense<0.000000e+00> : vector<128x128xf32>
    %9 = tpu.matmul %8, %6, %cst {dimension_numbers = #tpu.dot_dimension_numbers<[1], [0], [0], [1], [0, 0, 1, 1], [], []>} : vector<128x256xbf16>, vector<256x128xbf16>, vector<128x128xf32> -> vector<128x128xf32>
    %10 = arith.addf %7, %9 : vector<128x128xf32>
    %c0_5 = arith.constant 0 : index
    %c0_6 = arith.constant 0 : index
    %11 = vector.load %arg7[%c0_5, %c0_6] : memref<128x128xf32, #tpu.memory_space<vmem>>, vector<128x128xf32>
    tpu.vector_store %arg7[%c0_5, %c0_6], %10 {strides = array<i32>} : memref<128x128xf32, #tpu.memory_space<vmem>>, vector<128x128xf32>,
    %c0_i32_7 = arith.constant 0 : i32
    %12 = arith.cmpi eq, %arg1, %c0_i32_7 : i32
    %13 = arith.extui %12 : i1 to i32
    %c0_i32_8 = arith.constant 0 : i32
    %14 = arith.cmpi ne, %13, %c0_i32_8 : i32
    scf.if %14 {
      %c0_9 = arith.constant 0 : index
      %c0_10 = arith.constant 0 : index
      %15 = vector.load %arg7[%c0_9, %c0_10] : memref<128x128xf32, #tpu.memory_space<vmem>>, vector<128x128xf32>
      %c0_11 = arith.constant 0 : index
      %c0_12 = arith.constant 0 : index
      %16 = vector.load %arg4[%c0_11, %c0_12] : memref<128x128xf32, #tpu.memory_space<vmem>>, vector<128x128xf32>
      %cst_13 = arith.constant dense<0.000000e+00> : vector<128x128xf32>
      %17 = tpu.matmul %15, %16, %cst_13 {dimension_numbers = #tpu.dot_dimension_numbers<[1], [0], [0], [1], [0, 0, 1, 1], [], []>} : vector<128x128xf32>, vector<128x128xf32>, vector<128x128xf32> -> vector<128x128xf32>
      %cst_14 = arith.constant 1.000000e+03 : f32
      %18 = vector.broadcast %cst_14 : f32 to vector<128x128xf32>
      %19 = arith.mulf %17, %18 : vector<128x128xf32>
      %20 = math.roundeven %19 : vector<128x128xf32>
      %cst_15 = arith.constant 1.000000e+03 : f32
      %21 = vector.broadcast %cst_15 : f32 to vector<128x128xf32>
      %22 = arith.divf %20, %21 : vector<128x128xf32>
      %c0_16 = arith.constant 0 : index
      %c0_17 = arith.constant 0 : index
      %23 = vector.load %arg5[%c0_16, %c0_17] : memref<1x128xf32, #tpu.memory_space<vmem>>, vector<1x128xf32>
      %24 = vector.broadcast %23 : vector<1x128xf32> to vector<128x128xf32>
      %25 = arith.addf %22, %24 : vector<128x128xf32>
      %c0_18 = arith.constant 0 : index
      %c0_19 = arith.constant 0 : index
      %26 = vector.load %arg6[%c0_18, %c0_19] : memref<128x128xf32, #tpu.memory_space<vmem>>, vector<128x128xf32>
      tpu.vector_store %arg6[%c0_18, %c0_19], %25 {strides = array<i32>} : memref<128x128xf32, #tpu.memory_space<vmem>>, vector<128x128xf32>,
    } else {
    }
    return
  }
  func.func @transform_0(%arg0: i32, %arg1: i32) -> (i32, i32) {
    %c0_i32 = arith.constant 0 : i32
    return %arg0, %arg1 : i32, i32
  }
  func.func @transform_1(%arg0: i32, %arg1: i32) -> (i32, i32) {
    %c0_i32 = arith.constant 0 : i32
    %c0_i32_0 = arith.constant 0 : i32
    %c0_i32_1 = arith.constant 0 : i32
    return %c0_i32, %c0_i32_0 : i32, i32
  }
  func.func @transform_2(%arg0: i32, %arg1: i32) -> (i32, i32) {
    %c0_i32 = arith.constant 0 : i32
    %c0_i32_0 = arith.constant 0 : i32
    %c0_i32_1 = arith.constant 0 : i32
    return %c0_i32, %c0_i32_0 : i32, i32
  }
  func.func @transform_3(%arg0: i32, %arg1: i32) -> (i32, i32) {
    %c0_i32 = arith.constant 0 : i32
    %c0_i32_0 = arith.constant 0 : i32
    %c0_i32_1 = arith.constant 0 : i32
    return %c0_i32, %c0_i32_0 : i32, i32
  }
  func.func @transform_4(%arg0: i32, %arg1: i32) -> (i32, i32) {
    %c0_i32 = arith.constant 0 : i32
    %c0_i32_0 = arith.constant 0 : i32
    return %arg0, %c0_i32 : i32, i32
  }
}

</mosaic_0001>

<bundles_post_ra>
// kernel: tpu_custom_call.1
= control target key start
LH: loop header
LB: loop body
LE: loop exit
PB: predicated region body
PF: predicated region fallthrough
CT: control target
= control target key end

     0   :  { %s1874_s0 = inlined_call_operand.hbm [shape: bf16[256,256], index: 0, kind: input, shape index: {}]   ;;  %s1875_s1 = inlined_call_operand.hbm [shape: bf16[256,128], index: 1, kind: input, shape index: {}]   ;;  %s1876_s2 = inlined_call_operand.hbm [shape: f32[128,128], index: 2, kind: input, shape index: {}]   ;;  %s1877_s3 = inlined_call_operand.vmem [shape: f32[1,128], index: 3, kind: input, shape index: {}]   ;;  %s1878_s4 = inlined_call_operand.hbm [shape: f32[256,128], index: 4, kind: output, shape index: {}]  }
   0x1   :  { %1880 = sst [smem:[#allocation13_spill]] %s1875_s1 }
   0x2   :  { %9 = vsyncpa [#allocation4], 0 }
   0x3   :  { %11 = vsyncpa [#allocation4 + $0x1], 0 }
   0x4   :  { %12 = vsyncpa [#allocation7], 0 }
   0x5   :  { %13 = vsyncpa [#allocation5], 0 }
   0x6   :  { %15 = vsyncpa [#allocation5 + $0x1], 0  ;;  %s1626_s15 = smov 0   ;;  %s1628_s16 = smov 0  }
   0x7   :  { %s1630_s17 = smov 0   ;;  %s1632_s18 = smov 0  }
   0x8   :  { %s1634_s19 = smov 0   ;;  %s1636_s20 = smov 0  }
   0x9 LB: > { %s978_s21 = sadd.s32 4294967295, %s1590_s20   ;;  %s979_s22 = sadd.s32 4294967294, %s1590_s20   ;;  %s1590_s20 = sphi %s1636_s20, %s21_s20   ;;  %s1586_s19 = sphi %s1634_s19, %s1892_s19   ;;  %s1582_s18 = sphi %s1632_s18, %s1891_s18   ;;  %s1578_s17 = sphi %s1630_s17, %s1890_s17   ;;  %s1574_s16 = sphi %s1628_s16, %s1889_s16   ;;  %s1570_s15 = sphi %s1626_s15, %s1888_s15  }
   0xa   : > { %p55_p0 = scmp.ne.s32.totalorder %s1574_s16, %s1570_s15  ;;  %p1662_p1 = scmp.eq.s32.totalorder %s978_s21, 0 }
   0xb   : > { %p148_p2 = scmp.eq.s32.totalorder %s979_s22, 1  ;;  %p980_p4 = scmp.ge.s32.totalorder %s1590_s20, 1 }
   0xc   : > { %p1668_p3 = por %p1662_p1, %p55_p0  ;;  %p155_p6 = scmp.lt.s32.totalorder %s1590_s20, 3 }
   0xd   : > { %p1673_p5 = por %p148_p2, %p55_p0  ;;  %s1884_s1 = sld [smem:[#allocation13_spill]] }
   0xe   : > { %p1681_p7 = pnand %p980_p4, %p155_p6  ;;  %s1592_s30 = smov [#allocation6]  }
   0xf   : > { %s168_s5 = sshll.u32 %s1592_s30, 4  ;;  %p983_p10 = scmp.ge.s32.totalorder %s1590_s20, 2  ;;  %s169_s5 = int_to_ptr.vmem [resolvable:$true] %s168_s5 }
  0x10   : > { %p1333_p8 = pneg %p1681_p7  ;;  %s180_s8 = sshll.u32 %s1876_s2, 4  ;;  %s181_s8 = int_to_ptr.hbm [resolvable:$true] %s180_s8 }
  0x11   : > { %s1593_s9 = smov 64   ;;  %s1594_s10 = smov 4  }
  0x12   : > { %p1334_p9 = pnand %p1333_p8, %p1662_p1  ;;  %s1595_s11 = smov [#allocation8]  }
  0x13   : > { %s166_s28 = sshll.u32 %s1884_s1, 4  ;;  %s182_s12 = sshll.u32 %s1595_s11, 4  ;;  %s167_s28 = int_to_ptr.hbm [resolvable:$true] %s166_s28  ;;  %s183_s12 = int_to_ptr.vmem [resolvable:$true] %s182_s12 }
  0x14   : > { %1336 = dma.hbm_to_vmem [thread:$0]  (!%p1334_p9), %s167_s28, 2048, %s169_s5, [#allocation7], %s1593_s9, %s1593_s9, %s1594_s10  }
  0x15   : > { %s1879_s13 = smov 128   ;;  %s1597_s14 = smov 8  }
  0x16   : > { %1339 = dma.hbm_to_vmem [thread:$0]  (!%p1334_p9), %s181_s8, 2048, %s183_s12, [#allocation7], %s1879_s13, %s1879_s13, %s1597_s14  }
  0x17   : > { %p142_p11 = scmp.eq.s32.totalorder %s978_s21, 1  ;;  %s33_s22 = sadd.s32 1, %s1586_s19 }
  0x18   : > { %p35_p12 = scmp.ge.s32.totalorder %s33_s22, 2  ;;  %s42_s26 = sadd.s32 1, %s1578_s17 }
  0x19   : > { %p49_p13 = scmp.ne.s32.totalorder %s1578_s17, %s1574_s16  ;;  %p50_p0 = scmp.eq.s32.totalorder %s1590_s20, 0 }
  0x1a   : > { %s1894_s22 = smov (%p35_p12, %s33_s22), 0  ;;  %p1350_p4 = scmp.lt.s32.totalorder %s1590_s20, 2 }
  0x1b   : > { %p1705_p2 = por %p142_p11, %p49_p13  ;;  %s37_s28 = ssub.s32 %s1586_s19, %s1894_s22 }
  0x1c   : > { %s199_s30 = sand.u32 1, %s1578_s17   ;;  %p40_p6 = scmp.eq.s32.totalorder %s37_s28, 0 }
  0x1d   : > { %p51_p8 = por %p50_p0, %p49_p13  ;;  %s984_s5 = sshll.u32 %s199_s30, 7 }
  0x1e   : > { %s1127_s21 = sshll.u32 %s1586_s19, 7  ;;  %s203_s11 = scalar_lea.vmem [#allocation3], %s984_s5 }
  0x1f   : > { %s1715_s6 = scalar_select %p40_p6, %s1578_s17, %s42_s26  }
  0x20   : > { %s211_s9 = scalar_lea.hbm %s1874_s0, %s1127_s21  ;;  %s214_s12 = sshll.u32 %s203_s11, 4  ;;  %s215_s12 = int_to_ptr.vmem [resolvable:$true] %s214_s12 }
  0x21   : > { %s212_s10 = sshll.u32 %s211_s9, 4  ;;  %p1341_p9 = pnand %p1350_p4, %p51_p8  ;;  %s213_s10 = int_to_ptr.hbm [resolvable:$true] %s212_s10 }
  0x22   : > { %s200_s13 = scalar_lea.sflag [#allocation4], %s199_s30  ;;  %s1887_s1 = smov 128  }
  0x23   : > { %1343 = dma.hbm_to_vmem [thread:$0]  (!%p1341_p9), %s213_s10, 2048, %s215_s12, %s200_s13, %s1887_s1, %s1887_s1, %s1597_s14  }
  0x24   : > { %226 = sbr.rel (%p1681_p7) target bundleno = 444 (0x1bc), region = 36  ;;  %s1728_s26 = sand.u32 (!%p1681_p7), 1, %s1574_s16  }
  0x25   : > { %s989_s28 = sshll.u32 (!%p1681_p7), %s1728_s26, 7  ;;  %s229_s5 = scalar_lea.sflag (!%p1681_p7), [#allocation4], %s1728_s26 }
  0x26   : > { %s1734_s21 = scalar_lea.vmem (!%p1681_p7), [#allocation3], %s989_s28 }
  0x29   : > { %1557 = dma.done.wait (%p1668_p3), %s229_s5, 2048  }
  0x2a   : > { %1559 = vsyncadd (%p1668_p3), %s229_s5, 4294965248 }
  0x2b   : > { %1561 = dma.done.wait (%p1662_p1), [#allocation7], 4096  }
  0x2c   : > { %1563 = vsyncadd (%p1662_p1), [#allocation7], 4294963200  ;;  %v1135_v0 = vld [vmem:[#allocation6 + $0x38] sm:$0xff]  ;;  %v1134_v2 = vld [vmem:[#allocation6 + $0x30] sm:$0xff]  ;;  %s1787_s24 = scalar_lea.vmem [#allocation9], %s989_s28  ;;  %s1160_s29 = sshll.u32 %s1582_s18, 7 }
  0x2d   : > { %v1143_v1 = vld [vmem:[#allocation6 + $0x78] sm:$0xff]  ;;  %536 = vmatpush.bf16.msra.mxu0 %v1135_v0  ;;  %1161 = vmatpush.bf16.msra.mxu3 %v1135_v0  ;;  %v1142_v3 = vld [vmem:[#allocation6 + $0x70] sm:$0xff]  ;;  %v1133_v4 = vld [vmem:[#allocation6 + $0x28] sm:$0xff]  ;;  %s869_s30 = scalar_lea.hbm %s1878_s4, %s1160_s29  ;;  %s870_s7 = sshll.u32 %s1787_s24, 4  ;;  %s871_s7 = int_to_ptr.vmem [resolvable:$true] %s870_s7 }
  0x2e   : > { %585 = vmatpush.bf16.msra.mxu1 %v1143_v1  ;;  %v1141_v5 = vld [vmem:[#allocation6 + $0x68] sm:$0xff]  ;;  %v1132_v6 = vld [vmem:[#allocation6 + $0x20] sm:$0xff]  ;;  %v1131_v8 = vld [vmem:[#allocation6 + $0x18] sm:$0xff]  ;;  %s872_s8 = sshll.u32 %s869_s30, 4  ;;  %s858_s18 = scalar_lea.sflag [#allocation5], %s1728_s26  ;;  %s873_s8 = int_to_ptr.hbm [resolvable:$true] %s872_s8 }
  0x2f   : > { %v1140_v7 = vld [vmem:[#allocation6 + $0x60] sm:$0xff]  ;;  %v1139_v9 = vld [vmem:[#allocation6 + $0x58] sm:$0xff]  ;;  %v1130_v10 = vld [vmem:[#allocation6 + $0x10] sm:$0xff]  ;;  %s1518_s9 = sshra.s32 %s873_s8, 4  ;;  %s1524_s28 = scalar_lea.hbm %s1878_s4, 256  ;;  %s1519_s9 = int_to_ptr.hbm [resolvable:$true] %s1518_s9 }
  0x30   : > { %v1138_v11 = vld [vmem:[#allocation6 + $0x50] sm:$0xff]  ;;  %v1129_v12 = vld [vmem:[#allocation6 + $0x8] sm:$0xff]  ;;  %v1128_v14 = vld [vmem:[#allocation6] sm:$0xff]  ;;  %s1520_s10 = scalar_lea.hbm %s1519_s9, 128  ;;  %p1525_p11 = scmp.lt.s32.totalorder %s1519_s9, %s1878_s4 }
  0x31   : > { %537 = vmatpush.bf16.msra.mxu0 %v1134_v2  ;;  %1162 = vmatpush.bf16.msra.mxu3 %v1134_v2  ;;  %v1137_v13 = vld [vmem:[#allocation6 + $0x48] sm:$0xff]  ;;  %v995_v15 = vld [vmem:[%s1734_s21] sm:$0xf]  ;;  %v1144_v20 = vld [vmem:[%s1734_s21 + $0x4] sm:$0xf]  ;;  %p1521_p1 = scmp.ne.s32.totalorder %s1519_s9, %s1520_s10  ;;  %p1526_p12 = scmp.lt.s32.totalorder %s1524_s28, %s1520_s10 }
  0x32   : > { %586 = vmatpush.bf16.msra.mxu1 %v1142_v3  ;;  %v1145_v16 = vld [vmem:[%s1734_s21 + $0x4] sm:$0xf0]  ;;  %v1043_v17 = vld [vmem:[%s1734_s21 + $0x60] sm:$0xf]  ;;  %v997_v21 = vld [vmem:[%s1734_s21 + $0x8] sm:$0xf0] }
  0x33   : > { %v1157_v18 = vld [vmem:[%s1734_s21 + $0x64] sm:$0xf0]  ;;  %v1136_v19 = vld [vmem:[#allocation6 + $0x40] sm:$0xff]  ;;  %v996_v22 = vor.u32 %v1145_v16, %v995_v15  ;;  %v1000_v24 = vor.u32 %v1144_v20, %v997_v21  ;;  %v1003_v25 = vld [vmem:[%s1734_s21 + $0x10] sm:$0xf]  ;;  %p1522_p3 = pnand %p1521_p1, %p1705_p2  ;;  %p1527_p13 = por %p1526_p12, %p1525_p11 }
  0x34   : > { %v1044_v23 = vor.u32 %v1157_v18, %v1043_v17  ;;  %v1147_v26 = vld [vmem:[%s1734_s21 + $0x14] sm:$0xf0]  ;;  %v1051_v27 = vld [vmem:[%s1734_s21 + $0x70] sm:$0xf]  ;;  %v1146_v29 = vld [vmem:[%s1734_s21 + $0x14] sm:$0xf] }
  0x35   : > { %538 = vmatpush.bf16.msra.mxu0 %v1133_v4  ;;  %1163 = vmatpush.bf16.msra.mxu3 %v1133_v4  ;;  %v1159_v28 = vld [vmem:[%s1734_s21 + $0x74] sm:$0xf0]  ;;  %v1005_v30 = vld [vmem:[%s1734_s21 + $0x18] sm:$0xf0]  ;;  %v1004_v31 = vor.u32 %v1147_v26, %v1003_v25  ;;  %v1011_v34 = vld [vmem:[%s1734_s21 + $0x20] sm:$0xf]  ;;  %p1523_p7 = pneg %p1522_p3 }
  0x36   : > { %587 = vmatpush.bf16.msra.mxu1 %v1141_v5  ;;  %v1052_v32 = vor.u32 %v1159_v28, %v1051_v27  ;;  %v1008_v33 = vor.u32 %v1146_v29, %v1005_v30  ;;  %v1149_v35 = vld [vmem:[%s1734_s21 + $0x24] sm:$0xf0]  ;;  %v1156_v36 = vld [vmem:[%s1734_s21 + $0x64] sm:$0xf]  ;;  %v1045_v37 = vld [vmem:[%s1734_s21 + $0x68] sm:$0xf0] }
  0x37   : > { %v1148_v38 = vld [vmem:[%s1734_s21 + $0x24] sm:$0xf]  ;;  %v1013_v39 = vld [vmem:[%s1734_s21 + $0x28] sm:$0xf0]  ;;  %v1012_v40 = vor.u32 %v1149_v35, %v1011_v34  ;;  %v1048_v41 = vor.u32 %v1156_v36, %v1045_v37  ;;  %v1019_v43 = vld [vmem:[%s1734_s21 + $0x30] sm:$0xf]  ;;  %p1528_p0 = pnand %p1527_p13, %p1523_p7 }
  0x38   : > { %v1016_v42 = vor.u32 %v1148_v38, %v1013_v39  ;;  %v1151_v44 = vld [vmem:[%s1734_s21 + $0x34] sm:$0xf0]  ;;  %v1158_v45 = vld [vmem:[%s1734_s21 + $0x74] sm:$0xf]  ;;  %v1053_v46 = vld [vmem:[%s1734_s21 + $0x78] sm:$0xf0] }
  0x39   : > { %539 = vmatpush.bf16.msra.mxu0 %v1132_v6  ;;  %1164 = vmatpush.bf16.msra.mxu3 %v1132_v6  ;;  %v1150_v47 = vld [vmem:[%s1734_s21 + $0x34] sm:$0xf]  ;;  %v1021_v48 = vld [vmem:[%s1734_s21 + $0x38] sm:$0xf0]  ;;  %v1020_v49 = vor.u32 %v1151_v44, %v1019_v43  ;;  %v1056_v50 = vor.u32 %v1158_v45, %v1053_v46  ;;  %v698_v54 = vld [vmem:[#allocation8 + $0x68] sm:$0xff] }
  0x3a   : > { %588 = vmatpush.bf16.msra.mxu1 %v1140_v7  ;;  %v1024_v51 = vor.u32 %v1150_v47, %v1021_v48  ;;  %v700_v52 = vld [vmem:[#allocation8 + $0x78] sm:$0xff]  ;;  %v699_v53 = vld [vmem:[#allocation8 + $0x70] sm:$0xff]  ;;  %v697_v55 = vld [vmem:[#allocation8 + $0x60] sm:$0xff] }
  0x3b   : > { %701 = vmatpush.msra.mxu2 %v700_v52  ;;  %v696_v56 = vld [vmem:[#allocation8 + $0x58] sm:$0xff]  ;;  %v1027_v57 = vld [vmem:[%s1734_s21 + $0x40] sm:$0xf]  ;;  %v1153_v58 = vld [vmem:[%s1734_s21 + $0x44] sm:$0xf0] }
  0x3c   : > { %v695_v59 = vld [vmem:[#allocation8 + $0x50] sm:$0xff]  ;;  %v1152_v60 = vld [vmem:[%s1734_s21 + $0x44] sm:$0xf]  ;;  %v1029_v61 = vld [vmem:[%s1734_s21 + $0x48] sm:$0xf0]  ;;  %v1028_v63 = vor.u32 %v1153_v58, %v1027_v57 }
  0x3d   : > { %540 = vmatpush.bf16.msra.mxu0 %v1131_v8  ;;  %1165 = vmatpush.bf16.msra.mxu3 %v1131_v8  ;;  %v694_v62 = vld [vmem:[#allocation8 + $0x48] sm:$0xff]  ;;  %v1032_v0 = vor.u32 %v1152_v60, %v1029_v61  ;;  %v692_v2 = vld [vmem:[#allocation8 + $0x38] sm:$0xff]  ;;  %v685_v15 = vld [vmem:[#allocation8] sm:$0xff] }
  0x3e   : > { %589 = vmatpush.bf16.msra.mxu1 %v1139_v9  ;;  %702 = vmatpush.msra.mxu2 %v699_v53  ;;  %v690_v4 = vld [vmem:[#allocation8 + $0x28] sm:$0xff]  ;;  %v688_v6 = vld [vmem:[#allocation8 + $0x18] sm:$0xff] }
  0x3f   : > { %v1155_v8 = vld [vmem:[%s1734_s21 + $0x54] sm:$0xf0] }
  0x40   : > { %703 = vmatpush.msra.mxu2 %v698_v54 }
  0x41   : > { %541 = vmatpush.bf16.msra.mxu0 %v1130_v10  ;;  %1166 = vmatpush.bf16.msra.mxu3 %v1130_v10  ;;  %v1154_v10 = vld [vmem:[%s1734_s21 + $0x54] sm:$0xf] }
  0x42   : > { %590 = vmatpush.bf16.msra.mxu1 %v1138_v11  ;;  %704 = vmatpush.msra.mxu2 %v697_v55 }
  0x44   : > { %705 = vmatpush.msra.mxu2 %v696_v56 }
  0x45   : > { %542 = vmatpush.bf16.msra.mxu0 %v1129_v12  ;;  %1167 = vmatpush.bf16.msra.mxu3 %v1129_v12 }
  0x46   : > { %591 = vmatpush.bf16.msra.mxu1 %v1137_v13  ;;  %706 = vmatpush.msra.mxu2 %v695_v59 }
  0x48   : > { %707 = vmatpush.msra.mxu2 %v694_v62 }
  0x49   : > { %543 = vmatpush.bf16.msra.mxu0 %v1128_v14  ;;  %1168 = vmatpush.bf16.msra.mxu3 %v1128_v14  ;;  %v686_v14 = vld [vmem:[#allocation8 + $0x8] sm:$0xff] }
  0x4a   : > { %592 = vmatpush.bf16.msra.mxu1 %v1136_v19 }
  0x4c   : > { %544 = vmatmul.bf16.vlgmr.msra.gmra.mxu0 %v996_v22  ;;  %574 = vmatmul.bf16.vlgmr.msra.gmra.mxu3 %v1044_v23 }
  0x4d   : > { %1169 = vmatpush.bf16.msrb.mxu3 %v1143_v1  ;;  %593 = vmatmul.bf16.vlgmr.msra.gmra.mxu1 %v1000_v24  ;;  %v693_v1 = vld [vmem:[#allocation8 + $0x40] sm:$0xff] }
  0x4e   : > { %708 = vmatpush.msra.mxu2 %v693_v1 }
  0x50   : > { %709 = vmatpush.msra.mxu2 %v692_v2 }
  0x51   : > { %1170 = vmatpush.bf16.msrb.mxu3 %v1142_v3  ;;  %v691_v3 = vld [vmem:[#allocation8 + $0x30] sm:$0xff] }
  0x52   : > { %710 = vmatpush.msra.mxu2 %v691_v3 }
  0x54   : > { %711 = vmatpush.msra.mxu2 %v690_v4 }
  0x55   : > { %1171 = vmatpush.bf16.msrb.mxu3 %v1141_v5  ;;  %v689_v5 = vld [vmem:[#allocation8 + $0x20] sm:$0xff] }
  0x56   : > { %712 = vmatpush.msra.mxu2 %v689_v5 }
  0x58   : > { %713 = vmatpush.msra.mxu2 %v688_v6 }
  0x59   : > { %1172 = vmatpush.bf16.msrb.mxu3 %v1140_v7  ;;  %v1035_v7 = vld [vmem:[%s1734_s21 + $0x50] sm:$0xf] }
  0x5a   : > { %v1036_v12 = vor.u32 %v1155_v8, %v1035_v7 }
  0x5c   : > { %549 = vmatmul.bf16.gmra.mxu0 %v1004_v31  ;;  %579 = vmatmul.bf16.gmra.mxu3 %v1052_v32 }
  0x5d   : > { %1173 = vmatpush.bf16.msrb.mxu3 %v1139_v9  ;;  %598 = vmatmul.bf16.gmra.mxu1 %v1008_v33  ;;  %v687_v9 = vld [vmem:[#allocation8 + $0x10] sm:$0xff] }
  0x5e   : > { %714 = vmatpush.msra.mxu2 %v687_v9 }
  0x60   : > { %715 = vmatpush.msra.mxu2 %v686_v14 }
  0x61   : > { %1174 = vmatpush.bf16.msrb.mxu3 %v1138_v11  ;;  %v1037_v11 = vld [vmem:[%s1734_s21 + $0x58] sm:$0xf0] }
  0x62   : > { %716 = vmatpush.msra.mxu2 %v685_v15 }
  0x65   : > { %1175 = vmatpush.bf16.msrb.mxu3 %v1137_v13  ;;  %v1040_v13 = vor.u32 %v1154_v10, %v1037_v11 }
  0x69   : > { %1176 = vmatpush.bf16.msrb.mxu3 %v1136_v19 }
  0x6c   : > { %554 = vmatmul.bf16.gmra.mxu0 %v1012_v40  ;;  %623 = vmatmul.bf16.vlgmr.msrb.gmra.mxu3 %v1048_v41 }
  0x6d   : > { %603 = vmatmul.bf16.gmra.mxu1 %v1016_v42  ;;  %1177 = vmatpush.msra.mxu3 %v700_v52 }
  0x6f   : > { %1178 = vmatpush.msra.mxu3 %v699_v53 }
  0x71   : > { %1179 = vmatpush.msra.mxu3 %v698_v54 }
  0x73   : > { %1180 = vmatpush.msra.mxu3 %v697_v55 }
  0x75   : > { %1181 = vmatpush.msra.mxu3 %v696_v56 }
  0x77   : > { %1182 = vmatpush.msra.mxu3 %v695_v59 }
  0x79   : > { %1183 = vmatpush.msra.mxu3 %v694_v62 }
  0x7b   : > { %1184 = vmatpush.msra.mxu3 %v693_v1 }
  0x7c   : > { %559 = vmatmul.bf16.gmra.mxu0 %v1020_v49  ;;  %628 = vmatmul.bf16.gmra.mxu3 %v1056_v50 }
  0x7d   : > { %608 = vmatmul.bf16.gmra.mxu1 %v1024_v51  ;;  %1185 = vmatpush.msra.mxu3 %v692_v2 }
  0x7f   : > { %1186 = vmatpush.msra.mxu3 %v691_v3 }
  0x81   : > { %1187 = vmatpush.msra.mxu3 %v690_v4 }
  0x83   : > { %1188 = vmatpush.msra.mxu3 %v689_v5 }
  0x85   : > { %1189 = vmatpush.msra.mxu3 %v688_v6 }
  0x87   : > { %1190 = vmatpush.msra.mxu3 %v687_v9 }
  0x89   : > { %1191 = vmatpush.msra.mxu3 %v686_v14 }
  0x8b   : > { %1192 = vmatpush.msra.mxu3 %v685_v15 }
  0x8c   : > { %564 = vmatmul.bf16.gmra.mxu0 %v1028_v63 }
  0x8d   : > { %613 = vmatmul.bf16.gmra.mxu1 %v1032_v0  ;;  %v1598_v0 = vmov 1000.0  }
  0x8e   : > { %1412 = vrcp.f32 %v1598_v0 }
  0x94   : > { %v1413_v1 = vpop.eup %1412 }
  0x95   : > { %v799_v2 = vmul.f32 1000.0, %v1413_v1  ;;  %vm803_vm0 = vweird.f32 %v1413_v1 }
  0x97   : > { %v800_v3 = vsub.f32 1.0, %v799_v2 }
  0x99   : > { %v801_v6 = vmul.f32 %v1413_v1, %v800_v3 }
  0x9b   : > { %v802_v9 = vadd.f32 %v1413_v1, %v801_v6 }
  0x9c   : > { %569 = vmatmul.bf16.gmra.mxu0 %v1036_v12 }
  0x9d   : > { %618 = vmatmul.bf16.gmra.mxu1 %v1040_v13  ;;  %v1776_v15 = vsel %vm803_vm0, %v1413_v1, %v802_v9 }
  0xc9   : > { %v545_v16 = vpop.f32.mrf.mxu0 }
  0xca   : > { %v594_v17 = vpop.f32.mrf.mxu1 }
  0xcb   : > { %v595_v18 = vadd.f32 %v594_v17, %v545_v16  ;;  %v1781_v17 = vld [vmem:[%s1877_s3] ss:$0 sm:$0xff] }
  0xcd   : > { %717 = vmatmul.f32.vlgmr.msra.gmra.mxu2 %v595_v18 }
  0xcf   : > { %v575_v19 = vpop.f32.mrf.mxu3 }
  0xd1   : > { %v547_v20 = vpop.f32.mrf.mxu0 }
  0xd2   : > { %v596_v21 = vpop.f32.mrf.mxu1 }
  0xd3   : > { %v597_v22 = vadd.f32 %v596_v21, %v547_v20 }
  0xd5   : > { %720 = vmatmul.f32.gmra.mxu2 %v597_v22 }
  0xd7   : > { %v577_v23 = vpop.f32.mrf.mxu3 }
  0xd9   : > { %v550_v24 = vpop.f32.mrf.mxu0 }
  0xda   : > { %v599_v25 = vpop.f32.mrf.mxu1 }
  0xdb   : > { %v600_v26 = vadd.f32 %v599_v25, %v550_v24 }
  0xdd   : > { %723 = vmatmul.f32.gmra.mxu2 %v600_v26 }
  0xdf   : > { %v580_v27 = vpop.f32.mrf.mxu3 }
  0xe1   : > { %v552_v28 = vpop.f32.mrf.mxu0 }
  0xe2   : > { %v601_v29 = vpop.f32.mrf.mxu1 }
  0xe3   : > { %v602_v30 = vadd.f32 %v601_v29, %v552_v28 }
  0xe5   : > { %726 = vmatmul.f32.gmra.mxu2 %v602_v30 }
  0xe7   : > { %v582_v31 = vpop.f32.mrf.mxu3 }
  0xe9   : > { %v555_v32 = vpop.f32.mrf.mxu0 }
  0xea   : > { %v604_v33 = vpop.f32.mrf.mxu1 }
  0xeb   : > { %v605_v34 = vadd.f32 %v604_v33, %v555_v32 }
  0xed   : > { %729 = vmatmul.f32.gmra.mxu2 %v605_v34 }
  0xef   : > { %v624_v35 = vpop.f32.mrf.mxu3 }
  0xf0   : > { %v625_v36 = vadd.f32 %v624_v35, %v575_v19 }
  0xf1   : > { %v557_v37 = vpop.f32.mrf.mxu0 }
  0xf2   : > { %v606_v38 = vpop.f32.mrf.mxu1  ;;  %753 = vmatmul.f32.vlgmr.msra.gmra.mxu3 %v625_v36 }
  0xf3   : > { %v607_v39 = vadd.f32 %v606_v38, %v557_v37 }
  0xf5   : > { %732 = vmatmul.f32.gmra.mxu2 %v607_v39 }
  0xf7   : > { %v626_v40 = vpop.f32.mrf.mxu3 }
  0xf8   : > { %v627_v41 = vadd.f32 %v626_v40, %v577_v23 }
  0xf9   : > { %v560_v42 = vpop.f32.mrf.mxu0 }
  0xfa   : > { %v609_v43 = vpop.f32.mrf.mxu1  ;;  %756 = vmatmul.f32.gmra.mxu3 %v627_v41 }
  0xfb   : > { %v610_v44 = vadd.f32 %v609_v43, %v560_v42 }
  0xfd   : > { %735 = vmatmul.f32.gmra.mxu2 %v610_v44 }
  0xff   : > { %v629_v45 = vpop.f32.mrf.mxu3 }
 0x100   : > { %v630_v46 = vadd.f32 %v629_v45, %v580_v27 }
 0x101   : > { %v562_v47 = vpop.f32.mrf.mxu0 }
 0x102   : > { %v611_v48 = vpop.f32.mrf.mxu1  ;;  %759 = vmatmul.f32.gmra.mxu3 %v630_v46 }
 0x103   : > { %v612_v49 = vadd.f32 %v611_v48, %v562_v47 }
 0x105   : > { %738 = vmatmul.f32.gmra.mxu2 %v612_v49 }
 0x107   : > { %v631_v50 = vpop.f32.mrf.mxu3 }
 0x108   : > { %v632_v51 = vadd.f32 %v631_v50, %v582_v31 }
 0x109   : > { %v565_v52 = vpop.f32.mrf.mxu0 }
 0x10a   : > { %v614_v53 = vpop.f32.mrf.mxu1  ;;  %762 = vmatmul.f32.gmra.mxu3 %v632_v51 }
 0x10b   : > { %v615_v54 = vadd.f32 %v614_v53, %v565_v52 }
 0x10d   : > { %741 = vmatmul.f32.gmra.mxu2 %v615_v54 }
 0x111   : > { %v567_v55 = vpop.f32.mrf.mxu0 }
 0x112   : > { %v616_v56 = vpop.f32.mrf.mxu1 }
 0x113   : > { %v617_v57 = vadd.f32 %v616_v56, %v567_v55 }
 0x115   : > { %744 = vmatmul.f32.gmra.mxu2 %v617_v57 }
 0x119   : > { %v570_v58 = vpop.f32.mrf.mxu0 }
 0x11a   : > { %v619_v59 = vpop.f32.mrf.mxu1 }
 0x11b   : > { %v620_v60 = vadd.f32 %v619_v59, %v570_v58 }
 0x11d   : > { %747 = vmatmul.f32.gmra.mxu2 %v620_v60 }
 0x121   : > { %v572_v61 = vpop.f32.mrf.mxu0 }
 0x122   : > { %v621_v62 = vpop.f32.mrf.mxu1 }
 0x123   : > { %v622_v63 = vadd.f32 %v621_v62, %v572_v61 }
 0x125   : > { %750 = vmatmul.f32.gmra.mxu2 %v622_v63 }
 0x150   : > { %v718_v4 = vpop.f32.mrf.mxu2 }
 0x151   : > { %v766_v5 = vmul.f32 1000.0, %v718_v4 }
 0x153   : > { %v1195_v7 = vcvt.f32.s32 %v766_v5  ;;  %v1193_v10 = vand.u32 2147483647, %v766_v5  ;;  %v1198_v12 = vand.u32 2147483648, %v766_v5 }
 0x155   : > { %v1196_v8 = vcvt.s32.f32 %v1195_v7  ;;  %vm1194_vm1 = vcmp.lt.f32.partialorder %v1193_v10, 8388608.0 }
 0x157   : > { %v1197_v11 = vand.u32 2147483647, %v1196_v8 }
 0x158   : > { %v721_v13 = vpop.f32.mrf.mxu2 }
 0x159   : > { %v1199_v14 = vor.u32 %v1198_v12, %v1197_v11  ;;  %v767_v16 = vmul.f32 1000.0, %v721_v13 }
 0x15b   : > { %v1200_v18 = vsel %vm1194_vm1, %v1199_v14, %v766_v5  ;;  %v1203_v19 = vcvt.f32.s32 %v767_v16  ;;  %v1201_v23 = vand.u32 2147483647, %v767_v16  ;;  %v1206_v25 = vand.u32 2147483648, %v767_v16 }
 0x15c   : > { %v805_v20 = vmul.f32 %v1200_v18, %v1776_v15 }
 0x15d   : > { %v1204_v21 = vcvt.s32.f32 %v1203_v19  ;;  %vm1202_vm2 = vcmp.lt.f32.partialorder %v1201_v23, 8388608.0 }
 0x15e   : > { %v825_v22 = vadd.f32 %v1781_v17, %v805_v20 }
 0x15f   : > { %v1205_v24 = vand.u32 2147483647, %v1204_v21 }
 0x160   : > { %841 = vst [vmem:[%s1787_s24] sm:$0xff] %v825_v22  ;;  %v724_v26 = vpop.f32.mrf.mxu2 }
 0x161   : > { %v1207_v27 = vor.u32 %v1206_v25, %v1205_v24  ;;  %v768_v28 = vmul.f32 1000.0, %v724_v26 }
 0x163   : > { %v1208_v29 = vsel %vm1202_vm2, %v1207_v27, %v767_v16  ;;  %v1211_v30 = vcvt.f32.s32 %v768_v28  ;;  %v1209_v34 = vand.u32 2147483647, %v768_v28  ;;  %v1214_v36 = vand.u32 2147483648, %v768_v28 }
 0x164   : > { %v806_v31 = vmul.f32 %v1208_v29, %v1776_v15 }
 0x165   : > { %v1212_v32 = vcvt.s32.f32 %v1211_v30  ;;  %vm1210_vm3 = vcmp.lt.f32.partialorder %v1209_v34, 8388608.0 }
 0x166   : > { %v826_v33 = vadd.f32 %v1781_v17, %v806_v31 }
 0x167   : > { %v1213_v35 = vand.u32 2147483647, %v1212_v32 }
 0x168   : > { %842 = vst [vmem:[%s1787_s24 + $0x8] sm:$0xff] %v826_v33  ;;  %v727_v37 = vpop.f32.mrf.mxu2 }
 0x169   : > { %v1215_v38 = vor.u32 %v1214_v36, %v1213_v35  ;;  %v769_v39 = vmul.f32 1000.0, %v727_v37 }
 0x16b   : > { %v1216_v40 = vsel %vm1210_vm3, %v1215_v38, %v768_v28  ;;  %v1219_v41 = vcvt.f32.s32 %v769_v39  ;;  %v1217_v45 = vand.u32 2147483647, %v769_v39  ;;  %v1222_v47 = vand.u32 2147483648, %v769_v39 }
 0x16c   : > { %v807_v42 = vmul.f32 %v1216_v40, %v1776_v15 }
 0x16d   : > { %v1220_v43 = vcvt.s32.f32 %v1219_v41  ;;  %vm1218_vm4 = vcmp.lt.f32.partialorder %v1217_v45, 8388608.0 }
 0x16e   : > { %v827_v44 = vadd.f32 %v1781_v17, %v807_v42 }
 0x16f   : > { %v1221_v46 = vand.u32 2147483647, %v1220_v43 }
 0x170   : > { %843 = vst [vmem:[%s1787_s24 + $0x10] sm:$0xff] %v827_v44  ;;  %v730_v48 = vpop.f32.mrf.mxu2 }
 0x171   : > { %v1223_v49 = vor.u32 %v1222_v47, %v1221_v46  ;;  %v770_v50 = vmul.f32 1000.0, %v730_v48 }
 0x173   : > { %v1224_v51 = vsel %vm1218_vm4, %v1223_v49, %v769_v39  ;;  %v1227_v52 = vcvt.f32.s32 %v770_v50  ;;  %v1225_v57 = vand.u32 2147483647, %v770_v50  ;;  %v1230_v60 = vand.u32 2147483648, %v770_v50 }
 0x174   : > { %v808_v53 = vmul.f32 %v1224_v51, %v1776_v15 }
 0x175   : > { %v1228_v54 = vcvt.s32.f32 %v1227_v52  ;;  %v754_v55 = vpop.f32.mrf.mxu3  ;;  %vm1226_vm5 = vcmp.lt.f32.partialorder %v1225_v57, 8388608.0 }
 0x176   : > { %v828_v56 = vadd.f32 %v1781_v17, %v808_v53  ;;  %v778_v58 = vmul.f32 1000.0, %v754_v55 }
 0x177   : > { %v1229_v59 = vand.u32 2147483647, %v1228_v54 }
 0x178   : > { %844 = vst [vmem:[%s1787_s24 + $0x18] sm:$0xff] %v828_v56  ;;  %v1291_v61 = vcvt.f32.s32 %v778_v58  ;;  %v733_v62 = vpop.f32.mrf.mxu2  ;;  %v1289_v3 = vand.u32 2147483647, %v778_v58  ;;  %v1294_v7 = vand.u32 2147483648, %v778_v58 }
 0x179   : > { %v1231_v63 = vor.u32 %v1230_v60, %v1229_v59  ;;  %v771_v0 = vmul.f32 1000.0, %v733_v62 }
 0x17a   : > { %v1292_v1 = vcvt.s32.f32 %v1291_v61  ;;  %vm1290_vm6 = vcmp.lt.f32.partialorder %v1289_v3, 8388608.0 }
 0x17b   : > { %v1232_v2 = vsel %vm1226_vm5, %v1231_v63, %v770_v50  ;;  %v1235_v4 = vcvt.f32.s32 %v771_v0  ;;  %v1233_v12 = vand.u32 2147483647, %v771_v0  ;;  %v1238_v16 = vand.u32 2147483648, %v771_v0 }
 0x17c   : > { %v809_v5 = vmul.f32 %v1232_v2, %v1776_v15  ;;  %v1293_v6 = vand.u32 2147483647, %v1292_v1 }
 0x17d   : > { %v1236_v8 = vcvt.s32.f32 %v1235_v4  ;;  %v757_v9 = vpop.f32.mrf.mxu3  ;;  %vm1234_vm7 = vcmp.lt.f32.partialorder %v1233_v12, 8388608.0 }
 0x17e   : > { %v829_v10 = vadd.f32 %v1781_v17, %v809_v5  ;;  %v1295_v11 = vor.u32 %v1294_v7, %v1293_v6  ;;  %v779_v13 = vmul.f32 1000.0, %v757_v9 }
 0x17f   : > { %v1237_v14 = vand.u32 2147483647, %v1236_v8 }
 0x180   : > { %845 = vst [vmem:[%s1787_s24 + $0x20] sm:$0xff] %v829_v10  ;;  %v1296_v18 = vsel %vm1290_vm6, %v1295_v11, %v778_v58  ;;  %v1299_v19 = vcvt.f32.s32 %v779_v13  ;;  %v736_v20 = vpop.f32.mrf.mxu2  ;;  %v1297_v27 = vand.u32 2147483647, %v779_v13  ;;  %v1302_v31 = vand.u32 2147483648, %v779_v13 }
 0x181   : > { %v817_v21 = vmul.f32 %v1296_v18, %v1776_v15  ;;  %v1239_v22 = vor.u32 %v1238_v16, %v1237_v14  ;;  %v772_v23 = vmul.f32 1000.0, %v736_v20 }
 0x182   : > { %v1300_v24 = vcvt.s32.f32 %v1299_v19  ;;  %vm1298_vm8 = vcmp.lt.f32.partialorder %v1297_v27, 8388608.0 }
 0x183   : > { %v837_v25 = vadd.f32 %v1781_v17, %v817_v21  ;;  %v1240_v26 = vsel %vm1234_vm7, %v1239_v22, %v771_v0  ;;  %v1243_v28 = vcvt.f32.s32 %v772_v23  ;;  %v1241_v36 = vand.u32 2147483647, %v772_v23 }
 0x184   : > { %v810_v29 = vmul.f32 %v1240_v26, %v1776_v15  ;;  %v1301_v30 = vand.u32 2147483647, %v1300_v24  ;;  %v1246_v39 = vand.u32 2147483648, %v772_v23 }
 0x185   : > { %853 = vst [vmem:[%s1787_s24 + $0x60] sm:$0xff] %v837_v25  ;;  %v1244_v32 = vcvt.s32.f32 %v1243_v28  ;;  %v760_v33 = vpop.f32.mrf.mxu3  ;;  %vm1242_vm9 = vcmp.lt.f32.partialorder %v1241_v36, 8388608.0 }
 0x186   : > { %v830_v34 = vadd.f32 %v1781_v17, %v810_v29  ;;  %v1303_v35 = vor.u32 %v1302_v31, %v1301_v30  ;;  %v780_v37 = vmul.f32 1000.0, %v760_v33 }
 0x187   : > { %v1245_v38 = vand.u32 2147483647, %v1244_v32 }
 0x188   : > { %846 = vst [vmem:[%s1787_s24 + $0x28] sm:$0xff] %v830_v34  ;;  %v1304_v40 = vsel %vm1298_vm8, %v1303_v35, %v779_v13  ;;  %v1307_v41 = vcvt.f32.s32 %v780_v37  ;;  %v739_v42 = vpop.f32.mrf.mxu2  ;;  %v1305_v49 = vand.u32 2147483647, %v780_v37  ;;  %v1310_v53 = vand.u32 2147483648, %v780_v37 }
 0x189   : > { %v818_v43 = vmul.f32 %v1304_v40, %v1776_v15  ;;  %v1247_v44 = vor.u32 %v1246_v39, %v1245_v38  ;;  %v773_v45 = vmul.f32 1000.0, %v739_v42 }
 0x18a   : > { %v1308_v46 = vcvt.s32.f32 %v1307_v41  ;;  %vm1306_vm10 = vcmp.lt.f32.partialorder %v1305_v49, 8388608.0 }
 0x18b   : > { %v838_v47 = vadd.f32 %v1781_v17, %v818_v43  ;;  %v1248_v48 = vsel %vm1242_vm9, %v1247_v44, %v772_v23  ;;  %v1251_v50 = vcvt.f32.s32 %v773_v45  ;;  %v1249_v58 = vand.u32 2147483647, %v773_v45 }
 0x18c   : > { %v811_v51 = vmul.f32 %v1248_v48, %v1776_v15  ;;  %v1309_v52 = vand.u32 2147483647, %v1308_v46  ;;  %v1254_v61 = vand.u32 2147483648, %v773_v45 }
 0x18d   : > { %854 = vst [vmem:[%s1787_s24 + $0x68] sm:$0xff] %v838_v47  ;;  %v1252_v54 = vcvt.s32.f32 %v1251_v50  ;;  %v763_v55 = vpop.f32.mrf.mxu3  ;;  %vm1250_vm11 = vcmp.lt.f32.partialorder %v1249_v58, 8388608.0 }
 0x18e   : > { %v831_v56 = vadd.f32 %v1781_v17, %v811_v51  ;;  %v1311_v57 = vor.u32 %v1310_v53, %v1309_v52  ;;  %v781_v59 = vmul.f32 1000.0, %v763_v55 }
 0x18f   : > { %v1253_v60 = vand.u32 2147483647, %v1252_v54 }
 0x190   : > { %847 = vst [vmem:[%s1787_s24 + $0x30] sm:$0xff] %v831_v56  ;;  %v1312_v62 = vsel %vm1306_vm10, %v1311_v57, %v780_v37  ;;  %v1315_v63 = vcvt.f32.s32 %v781_v59  ;;  %v742_v0 = vpop.f32.mrf.mxu2  ;;  %v1313_v7 = vand.u32 2147483647, %v781_v59  ;;  %v1318_v11 = vand.u32 2147483648, %v781_v59 }
 0x191   : > { %v819_v1 = vmul.f32 %v1312_v62, %v1776_v15  ;;  %v1255_v2 = vor.u32 %v1254_v61, %v1253_v60  ;;  %v774_v3 = vmul.f32 1000.0, %v742_v0 }
 0x192   : > { %v1316_v4 = vcvt.s32.f32 %v1315_v63  ;;  %vm1314_vm12 = vcmp.lt.f32.partialorder %v1313_v7, 8388608.0 }
 0x193   : > { %v839_v5 = vadd.f32 %v1781_v17, %v819_v1  ;;  %v1256_v6 = vsel %vm1250_vm11, %v1255_v2, %v773_v45  ;;  %v1259_v8 = vcvt.f32.s32 %v774_v3  ;;  %v1257_v16 = vand.u32 2147483647, %v774_v3 }
 0x194   : > { %v812_v9 = vmul.f32 %v1256_v6, %v1776_v15  ;;  %v1317_v10 = vand.u32 2147483647, %v1316_v4  ;;  %v1262_v19 = vand.u32 2147483648, %v774_v3 }
 0x195   : > { %855 = vst [vmem:[%s1787_s24 + $0x70] sm:$0xff] %v839_v5  ;;  %v1260_v12 = vcvt.s32.f32 %v1259_v8  ;;  %vm1258_vm13 = vcmp.lt.f32.partialorder %v1257_v16, 8388608.0 }
 0x196   : > { %v832_v13 = vadd.f32 %v1781_v17, %v812_v9  ;;  %v1319_v14 = vor.u32 %v1318_v11, %v1317_v10 }
 0x197   : > { %v1261_v18 = vand.u32 2147483647, %v1260_v12 }
 0x198   : > { %848 = vst [vmem:[%s1787_s24 + $0x38] sm:$0xff] %v832_v13  ;;  %v1320_v20 = vsel %vm1314_vm12, %v1319_v14, %v781_v59  ;;  %v745_v21 = vpop.f32.mrf.mxu2 }
 0x199   : > { %v820_v22 = vmul.f32 %v1320_v20, %v1776_v15  ;;  %v1263_v23 = vor.u32 %v1262_v19, %v1261_v18  ;;  %v775_v24 = vmul.f32 1000.0, %v745_v21 }
 0x19b   : > { %v840_v25 = vadd.f32 %v1781_v17, %v820_v22  ;;  %v1264_v26 = vsel %vm1258_vm13, %v1263_v23, %v774_v3  ;;  %v1267_v27 = vcvt.f32.s32 %v775_v24  ;;  %v1265_v31 = vand.u32 2147483647, %v775_v24 }
 0x19c   : > { %v813_v28 = vmul.f32 %v1264_v26, %v1776_v15  ;;  %v1270_v33 = vand.u32 2147483648, %v775_v24 }
 0x19d   : > { %856 = vst [vmem:[%s1787_s24 + $0x78] sm:$0xff] %v840_v25  ;;  %v1268_v29 = vcvt.s32.f32 %v1267_v27  ;;  %vm1266_vm14 = vcmp.lt.f32.partialorder %v1265_v31, 8388608.0 }
 0x19e   : > { %v833_v30 = vadd.f32 %v1781_v17, %v813_v28 }
 0x19f   : > { %v1269_v32 = vand.u32 2147483647, %v1268_v29 }
 0x1a0   : > { %849 = vst [vmem:[%s1787_s24 + $0x40] sm:$0xff] %v833_v30  ;;  %v748_v34 = vpop.f32.mrf.mxu2 }
 0x1a1   : > { %v1271_v35 = vor.u32 %v1270_v33, %v1269_v32  ;;  %v776_v36 = vmul.f32 1000.0, %v748_v34 }
 0x1a3   : > { %v1272_v37 = vsel %vm1266_vm14, %v1271_v35, %v775_v24  ;;  %v1275_v38 = vcvt.f32.s32 %v776_v36  ;;  %v1273_v42 = vand.u32 2147483647, %v776_v36  ;;  %v1278_v44 = vand.u32 2147483648, %v776_v36 }
 0x1a4   : > { %v814_v39 = vmul.f32 %v1272_v37, %v1776_v15 }
 0x1a5   : > { %v1276_v40 = vcvt.s32.f32 %v1275_v38  ;;  %vm1274_vm15 = vcmp.lt.f32.partialorder %v1273_v42, 8388608.0 }
 0x1a6   : > { %v834_v41 = vadd.f32 %v1781_v17, %v814_v39 }
 0x1a7   : > { %v1277_v43 = vand.u32 2147483647, %v1276_v40 }
 0x1a8   : > { %850 = vst [vmem:[%s1787_s24 + $0x48] sm:$0xff] %v834_v41  ;;  %v751_v45 = vpop.f32.mrf.mxu2 }
 0x1a9   : > { %v1279_v46 = vor.u32 %v1278_v44, %v1277_v43  ;;  %v777_v47 = vmul.f32 1000.0, %v751_v45 }
 0x1ab   : > { %v1280_v48 = vsel %vm1274_vm15, %v1279_v46, %v776_v36  ;;  %v1283_v49 = vcvt.f32.s32 %v777_v47  ;;  %v1281_v53 = vand.u32 2147483647, %v777_v47  ;;  %v1286_v55 = vand.u32 2147483648, %v777_v47 }
 0x1ac   : > { %v815_v50 = vmul.f32 %v1280_v48, %v1776_v15 }
 0x1ad   : > { %v1284_v51 = vcvt.s32.f32 %v1283_v49  ;;  %vm1282_vm0 = vcmp.lt.f32.partialorder %v1281_v53, 8388608.0 }
 0x1ae   : > { %v835_v52 = vadd.f32 %v1781_v17, %v815_v50 }
 0x1af   : > { %v1285_v54 = vand.u32 2147483647, %v1284_v51 }
 0x1b0   : > { %851 = vst [vmem:[%s1787_s24 + $0x50] sm:$0xff] %v835_v52 }
 0x1b1   : > { %v1287_v56 = vor.u32 %v1286_v55, %v1285_v54 }
 0x1b3   : > { %v1288_v57 = vsel %vm1282_vm0, %v1287_v56, %v777_v47 }
 0x1b4   : > { %v816_v58 = vmul.f32 %v1288_v57, %v1776_v15 }
 0x1b6   : > { %v836_v59 = vadd.f32 %v1781_v17, %v816_v58 }
 0x1b8   : > { %852 = vst [vmem:[%s1787_s24 + $0x58] sm:$0xff] %v836_v59 }
 0x1b9   : > { %1531 = shalt.err (!%p1528_p0)
}
 0x1ba   : > { %s1599_s26 = smov 128   ;;  %s1600_s1 = smov 8  }
 0x1bb   : > { %1331 = dma.vmem_to_hbm [thread:$0]  (%p1705_p2), %s871_s7, 2048, %s873_s8, %s858_s18, %s1599_s26, %s1599_s26, %s1600_s1  }
 0x1bc PF: > { %s887_s23 = sand.u32 1, %s1570_s15   ;;  %p1345_p4 = pnand %p983_p10, %p1673_p5 }
 0x1bd   : > { %s888_s24 = scalar_lea.sflag [#allocation5], %s887_s23 }
 0x1be   : > { %p1346_p6 = pneg %p1345_p4 }
 0x1c0   : > { %1565 = dma.done.wait (%p1346_p6), %s888_s24, 2048  }
 0x1c1   : > { %1567 = vsyncadd (%p1346_p6), %s888_s24, 4294965248  ;;  %s21_s20 = sadd.s32 1, %s1590_s20   ;;  %s1888_s15 = smov %s1574_s16 }
 0x1c2   : > { %p18_p8 = scmp.ge.s32.totalorder %s21_s20, 4   ;;  %s1889_s16 = smov %s1578_s17 }
 0x1c3   : > { %s1890_s17 = smov %s1715_s6  ;;  %s1891_s18 = smov %s1586_s19 }
 0x1c4   : > { %s1892_s19 = smov %s1894_s22  ;;  %20 = sbr.rel (!%p18_p8) target bundleno = 9 (0x9), region = 98 }
 0x1c9   :  { %894 = vsyncpa [#allocation4], 1 }
 0x1ca   :  { %896 = vsyncpa [#allocation4 + $0x1], 1 }
 0x1cb   :  { %897 = vsyncpa [#allocation7], 1 }
 0x1cc   :  { %898 = vsyncpa [#allocation5], 1 }
 0x1cd   :  { %900 = vsyncpa [#allocation5 + $0x1], 1 }

</bundles_post_ra>
